<compile_context>
chip_gen: v5e
topology: v5e:2x2
jax: 0.10.0
libtpu: 0.0.40
codegen_flags: <defaults>
</compile_context>

<pallas_src>
import functools

import jax
import jax.numpy as jnp
from jax.experimental import pallas as pl
from jax.experimental.pallas import tpu as pltpu


def _polynomial_kernel(w_ref, x_ref, o_ref, *, order: int):
    """w_ref: (2, order) f32 in SMEM; x_ref / o_ref: (C, lane_tile) VMEM blocks."""
    x = x_ref[...].astype(jnp.float32)                        # (C, TT)
    # ABS: 2-norm over the channel (sublane) axis -> (1, TT).  XLU reduce + EUP sqrt.
    mag = jnp.sqrt(jnp.sum(x * x, axis=0, keepdims=True))
    # Horner evaluation of both polynomials in |x|; coefficients are scalar
    # reads from SMEM broadcast over the lane tile (pure VPU FMA chain).
    # NOTE: Horner reorders the sum vs the torch monomial form (not bit-identical).
    acc0 = jnp.full_like(mag, w_ref[0, order - 1])
    acc1 = jnp.full_like(mag, w_ref[1, order - 1])
    for i in range(order - 2, -1, -1):                        # static unroll, order is small
        c0 = w_ref[0, i]
        c1 = w_ref[1, i]
        acc0 = acc0 * mag + c0
        acc1 = acc1 * mag + c1
    # Build the whole (C, TT) tile in-register (rows 0/1 = polynomials, rest 0)
    # and do a single unmasked full-tile store.
    row = jax.lax.broadcasted_iota(jnp.int32, x.shape, 0)     # (C, TT)
    out = jnp.where(row == 0, acc0, jnp.where(row == 1, acc1, 0.0))
    o_ref[...] = out.astype(o_ref.dtype)


def _tile_byte_budget() -> int:
    """~2 MiB per tile (v5e/v6e sit near HBM roofline); ~4 MiB on v7x (3.2 TB/s)."""
    try:
        info = pltpu.get_tpu_info()
        vmem = getattr(info, "vmem_capacity_bytes", None)
        if vmem is not None and vmem <= (64 << 20):           # v7x: 64 MiB VMEM / TC
            return 4 * 1024 * 1024
    except Exception:
        pass
    return 2 * 1024 * 1024


def _choose_lane_tile(C: int, T: int, itemsize: int, budget: int) -> int:
    """Pick a lane tile (multiple of 128 dividing T, T already 128-aligned).

    Goals, in priority order:
      * per-buffer tile bytes <= budget (keeps in+out double-buffering far below
        the scoped VMEM defaults on every generation),
      * at least 2 grid steps whenever T allows it (double-buffer overlap and
        v7x 2-TensorCore sharding), aiming for ~8 steps on long sequences,
      * a floor of ~1K lanes so each of the C strided DMA row segments stays long.
    """
    assert T % 128 == 0

    def rdown(v):
        return max(128, (v // 128) * 128)

    # Largest lane width whose (C, tt) tile fits the per-buffer byte budget.
    tt = min(T, rdown(budget // max(1, C * itemsize)))
    # Aim for >= ~8 grid steps, but keep a ~1K-lane floor for DMA efficiency.
    eight_step = rdown(T // 8) if T >= 8 * 128 else 128
    tt = min(tt, max(eight_step, min(T, 1024)))
    # Always leave at least 2 grid steps when T allows it.
    if T >= 256:
        tt = min(tt, rdown(T // 2))
    # Snap down to a 128-multiple that divides T.
    while tt > 128 and T % tt != 0:
        tt -= 128
    return tt


def polynomial_forward(x: jax.Array, weights: jax.Array, *, lane_tile=None) -> jax.Array:
    """Pallas equivalent of Polynomial(order).forward(x) for x of shape (1, C, T)."""
    B, C, T = x.shape
    if B != 1:
        raise ValueError("Polynomial.forward only type-checks for batch == 1")
    if C < 2:
        raise ValueError("need at least 2 channels (writes out[:, 0] and out[:, 1])")
    if weights.ndim != 2 or weights.shape[0] != 2:
        raise ValueError(f"weights must have shape (2, order), got {weights.shape}")
    order = int(weights.shape[1])
    if order == 0:
        return jnp.zeros_like(x)        # torch loop body never runs

    x2d = x[0]                                            # glue: (1, C, T) -> (C, T)
    # TODO(synk): torch keeps the weights in float64; TPU computes in float32.
    w = weights.astype(jnp.float32)

    # Pad T up to a multiple of 128 so every lane tile is aligned & unmasked;
    # the padded tail is sliced off after the call.
    T_pad = ((T + 127) // 128) * 128
    if T_pad != T:
        x2d = jnp.pad(x2d, ((0, 0), (0, T_pad - T)))

    itemsize = x.dtype.itemsize
    if lane_tile is None:
        lane_tile = _choose_lane_tile(C, T_pad, itemsize, _tile_byte_budget())
    if T_pad % lane_tile != 0 or lane_tile % 128 != 0:
        raise ValueError(f"lane_tile={lane_tile} incompatible with padded T={T_pad}")

    grid = (T_pad // lane_tile,)

    out2d = pl.pallas_call(
        functools.partial(_polynomial_kernel, order=order),
        out_shape=jax.ShapeDtypeStruct((C, T_pad), x.dtype),
        grid_spec=pltpu.PrefetchScalarGridSpec(
            num_scalar_prefetch=0,
            grid=grid,
            in_specs=[
                # (2, order) coefficients: whole array in SMEM, scalar reads.
                pl.BlockSpec(memory_space=pltpu.MemorySpace.SMEM),
                # x tile: channels whole on sublanes, T tiled on lanes.
                pl.BlockSpec((C, lane_tile), lambda i: (0, i)),
            ],
            out_specs=pl.BlockSpec((C, lane_tile), lambda i: (0, i)),
        ),
        compiler_params=pltpu.CompilerParams(
            # Tiles are independent -> shard grid across both TCs on v7x.
            dimension_semantics=("parallel",),
        ),
        cost_estimate=pl.CostEstimate(
            flops=T_pad * (2 * C + 4 * order),
            transcendentals=T_pad,                        # one sqrt per time step
            bytes_accessed=2 * C * T_pad * itemsize + 2 * order * 4,
        ),
    )(w, x2d)

    if T_pad != T:
        out2d = out2d[:, :T]
    return out2d[None]                                    # (C, T) -> (1, C, T)


def _polynomial_reference(x: jax.Array, weights: jax.Array) -> jax.Array:
    """Pure-JAX reference matching the PyTorch forward."""
    mag = jnp.sqrt(jnp.sum(x.astype(jnp.float32) ** 2, axis=1))    # (B, T)
    w = weights.astype(jnp.float32)
    p0 = jnp.zeros_like(mag)
    p1 = jnp.zeros_like(mag)
    for i in range(w.shape[1]):
        p0 = p0 + w[0, i] * mag ** i
        p1 = p1 + w[1, i] * mag ** i
    out = jnp.zeros_like(x)
    out = out.at[:, 0, :].set(p0.astype(x.dtype))
    out = out.at[:, 1, :].set(p1.astype(x.dtype))
    return out


if __name__ == "__main__":
    key = jax.random.PRNGKey(0)
    kx, kw, kp = jax.random.split(key, 3)

    B, C, T = 1, 4, 1024          # torch module requires batch == 1
    order = 5

    x = jax.random.normal(kx, (B, C, T), dtype=jnp.float32)
    weights = 0.5 * jax.random.normal(kw, (2, order), dtype=jnp.float32)

    # Default (auto-chosen lane tile -> grid of >= 2 steps) ...
    y = polynomial_forward(x, weights)
    y = jax.block_until_ready(y)
    # ... an explicitly tiled run (grid = (4,)) to exercise the pipeline path ...
    y_tiled = polynomial_forward(x, weights, lane_tile=256)
    y_tiled = jax.block_until_ready(y_tiled)

    ref = _polynomial_reference(x, weights)
    assert y.shape == x.shape
    assert jnp.allclose(y, ref, rtol=1e-4, atol=1e-3), "mismatch vs reference"
    assert jnp.allclose(y_tiled, ref, rtol=1e-4, atol=1e-3), "tiled mismatch vs reference"

    # ... and a non-128-aligned T to exercise the wrapper-side padding path.
    T2 = 1000
    x2 = jax.random.normal(kp, (B, C, T2), dtype=jnp.float32)
    y2 = jax.block_until_ready(polynomial_forward(x2, weights))
    ref2 = _polynomial_reference(x2, weights)
    assert y2.shape == x2.shape
    assert jnp.allclose(y2, ref2, rtol=1e-4, atol=1e-3), "padded mismatch vs reference"

    print("KERNEL_OK")
</pallas_src>

<mosaic_0001>
module attributes {stable_mosaic.version = 11 : i64} {
  func.func @_polynomial_kernel(%arg0: i32, %arg1: memref<2x5xf32, #tpu.memory_space<smem>>, %arg2: memref<4x512xf32, #tpu.memory_space<vmem>>, %arg3: memref<4x512xf32, #tpu.memory_space<vmem>>) attributes {dimension_semantics = [#tpu.dimension_semantics<parallel>], iteration_bounds = array<i64: 2>, scalar_prefetch = 0 : i64, scratch_operands = 0 : i64, tpu.core_type = #tpu.core_type<tc>, window_params = [{transform_indices = @transform_0, window_bounds = array<i64: 2, 5>}, {transform_indices = @transform_1, window_bounds = array<i64: 4, 512>}, {transform_indices = @transform_2, window_bounds = array<i64: 4, 512>}]} {
    %c0 = arith.constant 0 : index
    %c0_0 = arith.constant 0 : index
    %0 = vector.load %arg2[%c0, %c0_0] : memref<4x512xf32, #tpu.memory_space<vmem>>, vector<4x512xf32>
    %1 = arith.mulf %0, %0 : vector<4x512xf32>
    %cst = arith.constant dense<0.000000e+00> : vector<512xf32>
    %2 = vector.multi_reduction <add>, %1, %cst [0] : vector<4x512xf32> to vector<512xf32>
    %3 = vector.shape_cast %2 : vector<512xf32> to vector<1x512xf32>
    %4 = math.sqrt %3 : vector<1x512xf32>
    %c0_1 = arith.constant 0 : index
    %c4 = arith.constant 4 : index
    %5 = memref.load %arg1[%c0_1, %c4] : memref<2x5xf32, #tpu.memory_space<smem>>
    %6 = vector.broadcast %5 : f32 to vector<1x512xf32>
    %c1 = arith.constant 1 : index
    %c4_2 = arith.constant 4 : index
    %7 = memref.load %arg1[%c1, %c4_2] : memref<2x5xf32, #tpu.memory_space<smem>>
    %8 = vector.broadcast %7 : f32 to vector<1x512xf32>
    %c0_3 = arith.constant 0 : index
    %c3 = arith.constant 3 : index
    %9 = memref.load %arg1[%c0_3, %c3] : memref<2x5xf32, #tpu.memory_space<smem>>
    %c1_4 = arith.constant 1 : index
    %c3_5 = arith.constant 3 : index
    %10 = memref.load %arg1[%c1_4, %c3_5] : memref<2x5xf32, #tpu.memory_space<smem>>
    %11 = arith.mulf %6, %4 : vector<1x512xf32>
    %12 = vector.broadcast %9 : f32 to vector<1x512xf32>
    %13 = arith.addf %11, %12 : vector<1x512xf32>
    %14 = arith.mulf %8, %4 : vector<1x512xf32>
    %15 = vector.broadcast %10 : f32 to vector<1x512xf32>
    %16 = arith.addf %14, %15 : vector<1x512xf32>
    %c0_6 = arith.constant 0 : index
    %c2 = arith.constant 2 : index
    %17 = memref.load %arg1[%c0_6, %c2] : memref<2x5xf32, #tpu.memory_space<smem>>
    %c1_7 = arith.constant 1 : index
    %c2_8 = arith.constant 2 : index
    %18 = memref.load %arg1[%c1_7, %c2_8] : memref<2x5xf32, #tpu.memory_space<smem>>
    %19 = arith.mulf %13, %4 : vector<1x512xf32>
    %20 = vector.broadcast %17 : f32 to vector<1x512xf32>
    %21 = arith.addf %19, %20 : vector<1x512xf32>
    %22 = arith.mulf %16, %4 : vector<1x512xf32>
    %23 = vector.broadcast %18 : f32 to vector<1x512xf32>
    %24 = arith.addf %22, %23 : vector<1x512xf32>
    %c0_9 = arith.constant 0 : index
    %c1_10 = arith.constant 1 : index
    %25 = memref.load %arg1[%c0_9, %c1_10] : memref<2x5xf32, #tpu.memory_space<smem>>
    %c1_11 = arith.constant 1 : index
    %c1_12 = arith.constant 1 : index
    %26 = memref.load %arg1[%c1_11, %c1_12] : memref<2x5xf32, #tpu.memory_space<smem>>
    %27 = arith.mulf %21, %4 : vector<1x512xf32>
    %28 = vector.broadcast %25 : f32 to vector<1x512xf32>
    %29 = arith.addf %27, %28 : vector<1x512xf32>
    %30 = arith.mulf %24, %4 : vector<1x512xf32>
    %31 = vector.broadcast %26 : f32 to vector<1x512xf32>
    %32 = arith.addf %30, %31 : vector<1x512xf32>
    %c0_13 = arith.constant 0 : index
    %c0_14 = arith.constant 0 : index
    %33 = memref.load %arg1[%c0_13, %c0_14] : memref<2x5xf32, #tpu.memory_space<smem>>
    %c1_15 = arith.constant 1 : index
    %c0_16 = arith.constant 0 : index
    %34 = memref.load %arg1[%c1_15, %c0_16] : memref<2x5xf32, #tpu.memory_space<smem>>
    %35 = arith.mulf %29, %4 : vector<1x512xf32>
    %36 = vector.broadcast %33 : f32 to vector<1x512xf32>
    %37 = arith.addf %35, %36 : vector<1x512xf32>
    %38 = arith.mulf %32, %4 : vector<1x512xf32>
    %39 = vector.broadcast %34 : f32 to vector<1x512xf32>
    %40 = arith.addf %38, %39 : vector<1x512xf32>
    %41 = tpu.iota {dimensions = array<i32: 0>} : vector<4x512xi32>
    %c0_i32 = arith.constant 0 : i32
    %42 = vector.broadcast %c0_i32 : i32 to vector<4x512xi32>
    %43 = arith.cmpi eq, %41, %42 : vector<4x512xi32>
    %c1_i32 = arith.constant 1 : i32
    %44 = vector.broadcast %c1_i32 : i32 to vector<4x512xi32>
    %45 = arith.cmpi eq, %41, %44 : vector<4x512xi32>
    %cst_17 = arith.constant 0.000000e+00 : f32
    %46 = vector.shape_cast %40 : vector<1x512xf32> to vector<1x512xf32>
    %47 = vector.broadcast %46 : vector<1x512xf32> to vector<4x512xf32>
    %48 = vector.broadcast %cst_17 : f32 to vector<4x512xf32>
    %49 = arith.select %45, %47, %48 : vector<4x512xi1>, vector<4x512xf32>
    %50 = vector.shape_cast %37 : vector<1x512xf32> to vector<1x512xf32>
    %51 = vector.broadcast %50 : vector<1x512xf32> to vector<4x512xf32>
    %52 = arith.select %43, %51, %49 : vector<4x512xi1>, vector<4x512xf32>
    %c0_18 = arith.constant 0 : index
    %c0_19 = arith.constant 0 : index
    %53 = vector.load %arg3[%c0_18, %c0_19] : memref<4x512xf32, #tpu.memory_space<vmem>>, vector<4x512xf32>
    tpu.vector_store %arg3[%c0_18, %c0_19], %52 {strides = array<i32>} : memref<4x512xf32, #tpu.memory_space<vmem>>, vector<4x512xf32>,
    return
  }
  func.func @transform_0(%arg0: i32) -> (i32, i32) {
    %c0_i32 = arith.constant 0 : i32
    %c0_i32_0 = arith.constant 0 : i32
    %c0_i32_1 = arith.constant 0 : i32
    return %c0_i32, %c0_i32_0 : i32, i32
  }
  func.func @transform_1(%arg0: i32) -> (i32, i32) {
    %c0_i32 = arith.constant 0 : i32
    %c0_i32_0 = arith.constant 0 : i32
    return %c0_i32, %arg0 : i32, i32
  }
  func.func @transform_2(%arg0: i32) -> (i32, i32) {
    %c0_i32 = arith.constant 0 : i32
    %c0_i32_0 = arith.constant 0 : i32
    return %c0_i32, %arg0 : i32, i32
  }
}

</mosaic_0001>

<bundles_post_ra>
// kernel: tpu_custom_call.1
= control target key start
LH: loop header
LB: loop body
LE: loop exit
PB: predicated region body
PF: predicated region fallthrough
CT: control target
= control target key end

     0   :  { %7 = vsyncpa [#allocation5], 0  ;;  %s993_s0 = inlined_call_operand.hbm [shape: f32[2,5], index: 0, kind: input, shape index: {}]   ;;  %s994_s1 = inlined_call_operand.hbm [shape: f32[4,1024], index: 1, kind: input, shape index: {}]   ;;  %s995_s2 = inlined_call_operand.hbm [shape: f32[4,1024], index: 2, kind: output, shape index: {}]  }
   0x1   :  { %8 = vsyncpa [#allocation3], 0 }
   0x2   :  { %10 = vsyncpa [#allocation3 + $0x1], 0 }
   0x3   :  { %11 = vsyncpa [#allocation4], 0 }
   0x4   :  { %13 = vsyncpa [#allocation4 + $0x1], 0  ;;  %s704_s9 = smov 0   ;;  %s706_s10 = smov 0  }
   0x5   :  { %s708_s11 = smov 0   ;;  %s710_s12 = smov 0  }
   0x6 LB: > { %s725_s13 = sadd.s32 4294967295, %s686_s12   ;;  %s479_s14 = sadd.s32 4294967294, %s686_s12   ;;  %s686_s12 = sphi %s710_s12, %s1005_s12   ;;  %s682_s11 = sphi %s708_s11, %s1004_s11   ;;  %s678_s10 = sphi %s706_s10, %s1003_s10   ;;  %s674_s9 = sphi %s704_s9, %s1002_s9  }
   0x7   : > { %p60_p0 = scmp.ne.s32.totalorder %s678_s10, %s674_s9  ;;  %p61_p1 = scmp.eq.s32.totalorder %s725_s13, 0 }
   0x8   : > { %p84_p2 = scmp.eq.s32.totalorder %s725_s13, 1  ;;  %p90_p3 = scmp.eq.s32.totalorder %s479_s14, 1 }
   0x9   : > { %p734_p4 = por %p61_p1, %p60_p0  ;;  %p480_p5 = scmp.ge.s32.totalorder %s686_s12, 1 }
   0xa   : > { %p739_p6 = por %p90_p3, %p60_p0  ;;  %p97_p7 = scmp.lt.s32.totalorder %s686_s12, 3 }
   0xb   : > { %s109_s19 = sshll.u32 %s993_s0, 4  ;;  %s755_s21 = sadd.s32 1, %s686_s12   ;;  %s110_s19 = int_to_ptr.hbm [resolvable:$true] %s109_s19 }
   0xc   : > { %p747_p8 = pnand %p480_p5, %p97_p7  ;;  %s44_s22 = ssub.s32 %s686_s12, %s755_s21 }
   0xd   : > { %p45_p12 = scmp.eq.s32.totalorder %s44_s22, 0  ;;  %s47_s23 = sadd.s32 1, %s682_s11 }
   0xe   : > { %p514_p10 = pneg %p747_p8  ;;  %p54_p13 = scmp.ne.s32.totalorder %s682_s11, %s678_s10 }
   0xf   : > { %s688_s24 = smov [#allocation2]   ;;  %p55_p0 = scmp.eq.s32.totalorder %s686_s12, 0 }
  0x10   : > { %p515_p11 = pnand %p514_p10, %p61_p1  ;;  %p770_p3 = por %p84_p2, %p54_p13 }
  0x11   : > { %s765_s25 = scalar_select %p45_p12, %s682_s11, %s47_s23  }
  0x12   : > { %517 = dma.hbm_to_smem (!%p515_p11), %s110_s19, 32, %s688_s24, [#allocation5]  }
  0x13   : > { %s120_s27 = sand.u32 1, %s682_s11   ;;  %p56_p5 = por %p55_p0, %p54_p13 }
  0x14   : > { %p527_p7 = scmp.lt.s32.totalorder %s686_s12, 2  ;;  %s483_s28 = sshll.u32 %s120_s27, 4 }
  0x15   : > { %s504_s29 = sshll.u32 %s686_s12, 4  ;;  %s124_s6 = scalar_lea.vmem [#allocation6], %s483_s28 }
  0x16   : > { %s129_s4 = scalar_lea.hbm %s994_s1, %s504_s29  ;;  %s133_s7 = sshll.u32 %s124_s6, 4  ;;  %s134_s7 = int_to_ptr.vmem [resolvable:$true] %s133_s7 }
  0x17   : > { %s131_s5 = sshll.u32 %s129_s4, 4  ;;  %p780_p10 = pnand %p527_p7, %p56_p5  ;;  %s132_s5 = int_to_ptr.hbm [resolvable:$true] %s131_s5 }
  0x18   : > { %s121_s14 = scalar_lea.sflag [#allocation3], %s120_s27  ;;  %s586_s17 = sshra.s32 %s132_s5, 4  ;;  %s587_s17 = int_to_ptr.hbm [resolvable:$true] %s586_s17 }
  0x19   : > { %s588_s18 = scalar_lea.hbm %s587_s17, 16  ;;  %p590_p11 = pneg %p780_p10 }
  0x1a   : > { %p589_p2 = scmp.ne.s32.totalorder %s587_s17, %s588_s18  ;;  %s593_s23 = scalar_lea.hbm %s994_s1, 32 }
  0x1b   : > { %p594_p0 = scmp.lt.s32.totalorder %s587_s17, %s994_s1  ;;  %p595_p5 = scmp.lt.s32.totalorder %s593_s23, %s588_s18 }
  0x1c   : > { %p591_p12 = pnand %p590_p11, %p589_p2 }
  0x1d   : > { %p596_p7 = por %p595_p5, %p594_p0 }
  0x1e   : > { %p592_p13 = pneg %p591_p12 }
  0x20   : > { %p597_p9 = pnand %p596_p7, %p592_p13 }
  0x22   : > { %600 = shalt.err (!%p597_p9)
}
  0x23   : > { %521 = dma.hbm_to_vmem [thread:$0]  (!%p780_p10), %s132_s5, 256, %s134_s7, %s121_s14  }
  0x24   : > { %142 = sbr.rel (%p747_p8) target bundleno = 122 (0x7a), region = 28 }
  0x29   : > { %661 = dma.done.wait (%p61_p1), [#allocation5], 32  }
  0x2a   : > { %663 = vsyncadd (%p61_p1), [#allocation5], 4294967264  ;;  %s801_s27 = sand.u32 1, %s678_s10  }
  0x2b   : > { %s488_s29 = sshll.u32 %s801_s27, 4  ;;  %s150_s30 = scalar_lea.sflag [#allocation3], %s801_s27 }
  0x2c   : > { %s153_s3 = scalar_lea.vmem [#allocation6], %s488_s29 }
  0x2d   : > { %665 = dma.done.wait (%p734_p4), %s150_s30, 256  }
  0x2e   : > { %667 = vsyncadd (%p734_p4), %s150_s30, 4294967040 }
  0x2f   : > { %159 = sfence }
  0x30   : > { %v178_v0 = vld [vmem:[%s153_s3] sm:$0xff]  ;;  %v179_v1 = vld [vmem:[%s153_s3 + $0x8] sm:$0xff]  ;;  %vm195_vm0 = vcmask 1043456   ;;  %s490_s15 = sld [smem:[#allocation2 + $0x4]]  ;;  %s505_s19 = sshll.u32 %s725_s13, 4 }
  0x31   : > { %v180_v2 = vmul.f32 %v178_v0, %v178_v0  ;;  %v181_v3 = vmul.f32 %v179_v1, %v179_v1  ;;  %s491_s20 = sld [smem:[#allocation2 + $0x84]]  ;;  %s392_s23 = scalar_lea.hbm %s995_s2, %s505_s19 }
  0x32   : > { %s492_s4 = sld [smem:[#allocation2 + $0x3]]  ;;  %s175_s24 = scalar_lea.vmem [#allocation7], %s488_s29 }
  0x33   : > { %184 = vst [vmem:[#allocation1] ss:$2 sm:$0xff] %v180_v2  ;;  %s493_s5 = sld [smem:[#allocation2 + $0x83]]  ;;  %s394_s28 = sshll.u32 %s175_s24, 4  ;;  %s395_s28 = int_to_ptr.vmem [resolvable:$true] %s394_s28 }
  0x34   : > { %186 = vst [vmem:[#allocation1 + $0x10] ss:$2 sm:$0xff] %v181_v3  ;;  %s494_s6 = sld [smem:[#allocation2 + $0x2]]  ;;  %s396_s30 = sshll.u32 %s392_s23, 4  ;;  %s397_s30 = int_to_ptr.hbm [resolvable:$true] %s396_s30 }
  0x35   : > { %s495_s7 = sld [smem:[#allocation2 + $0x82]]  ;;  %s381_s29 = scalar_lea.sflag [#allocation4], %s801_s27 }
  0x36   : > { %s496_s8 = sld [smem:[#allocation2 + $0x1]]  ;;  %v833_v41 = vstv %s490_s15  ;;  %s630_s3 = sshra.s32 %s397_s30, 4  ;;  %s631_s3 = int_to_ptr.hbm [resolvable:$true] %s630_s3 }
  0x37   : > { %s827_s14 = sld [smem:[#allocation2 + $0x81]]  ;;  %v835_v44 = vstv %s491_s20  ;;  %s632_s15 = scalar_lea.hbm %s631_s3, 16 }
  0x38   : > { %s830_s17 = sld [smem:[#allocation2]]  ;;  %v837_v45 = vstv %s492_s4  ;;  %p633_p1 = scmp.ne.s32.totalorder %s631_s3, %s632_s15 }
  0x39   : > { %v840_v48 = vstv %s493_s5  ;;  %s844_s18 = sld [smem:[#allocation2 + $0x80]]  ;;  %s636_s5 = scalar_lea.hbm %s995_s2, 32 }
  0x3a   : > { %v187_v4 = vld.sshfl [vmem:[#allocation1] sm:$0xff pattern:$0x75316420]  ;;  %v188_v5 = vld.sshfl [vmem:[#allocation1 + $0x8] sm:$0xff pattern:$0x75316420]  ;;  %v842_v49 = vstv %s494_s6  ;;  %p634_p4 = pnand %p633_p1, %p770_p3  ;;  %p637_p9 = scmp.lt.s32.totalorder %s631_s3, %s995_s2 }
  0x3b   : > { %v189_v6 = vld.sshfl [vmem:[#allocation1 + $0x10] sm:$0xff pattern:$0x75316420]  ;;  %v190_v7 = vld.sshfl [vmem:[#allocation1 + $0x18] sm:$0xff pattern:$0x75316420]  ;;  %v847_v52 = vstv %s495_s7  ;;  %p638_p10 = scmp.lt.s32.totalorder %s636_s5, %s632_s15 }
  0x3c   : > { %v196_v8 = vsel %vm195_vm0, %v187_v4, 0.0  ;;  %v203_v9 = vsel %vm195_vm0, %v188_v5, 0.0  ;;  %v210_v10 = vsel %vm195_vm0, %v189_v6, 0.0  ;;  %v217_v11 = vsel %vm195_vm0, %v190_v7, 0.0  ;;  %p635_p8 = pneg %p634_p4 }
  0x3d   : > { %v197_v12 = vrot.slane %v196_v8, 4  ;;  %v204_v13 = vrot.slane %v203_v9, 4  ;;  %v211_v14 = vrot.slane %v210_v10, 4  ;;  %v218_v15 = vrot.slane %v217_v11, 4  ;;  %p639_p2 = por %p638_p10, %p637_p9 }
  0x3e   : > { %v849_v53 = vstv %s496_s8  ;;  %v858_v0 = vstv %s827_s14  ;;  %v861_v1 = vstv %s830_s17  ;;  %v356_v4 = vlaneseq }
  0x3f   : > { %v198_v16 = vadd.f32 %v197_v12, %v196_v8  ;;  %v205_v17 = vadd.f32 %v204_v13, %v203_v9  ;;  %v212_v18 = vadd.f32 %v211_v14, %v210_v10  ;;  %v219_v19 = vadd.f32 %v218_v15, %v217_v11  ;;  %p640_p11 = pnand %p639_p2, %p635_p8 }
  0x40   : > { %v869_v10 = vstv %s844_s18 }
  0x41   : > { %v199_v20 = vrot.slane %v198_v16, 2  ;;  %v206_v21 = vrot.slane %v205_v17, 2  ;;  %v213_v22 = vrot.slane %v212_v18, 2  ;;  %v220_v23 = vrot.slane %v219_v19, 2 }
  0x43   : > { %v200_v24 = vadd.f32 %v199_v20, %v198_v16  ;;  %v207_v25 = vadd.f32 %v206_v21, %v205_v17  ;;  %v214_v26 = vadd.f32 %v213_v22, %v212_v18  ;;  %v221_v27 = vadd.f32 %v220_v23, %v219_v19 }
  0x44   : > { %v883_v17 = vshrl.u32 %v356_v4, 7 }
  0x45   : > { %v201_v28 = vrot.slane %v200_v24, 1  ;;  %v208_v29 = vrot.slane %v207_v25, 1  ;;  %v215_v30 = vrot.slane %v214_v26, 1  ;;  %v222_v31 = vrot.slane %v221_v27, 1 }
  0x46   : > { %vm358_vm9 = vcmp.eq.s32.totalorder %v883_v17, 0  ;;  %vm359_vm10 = vcmp.eq.s32.totalorder %v883_v17, 1 }
  0x47   : > { %v815_v32 = vadd.f32 %v201_v28, %v200_v24  ;;  %v817_v33 = vadd.f32 %v208_v29, %v207_v25  ;;  %v819_v34 = vadd.f32 %v215_v30, %v214_v26  ;;  %v821_v35 = vadd.f32 %v222_v31, %v221_v27 }
  0x49   : > { %563 = vrsqrt.f32 %v815_v32  ;;  %vm231_vm1 = vcmp.eq.f32.partialorder %v815_v32, inf  ;;  %vm233_vm2 = vcmp.eq.f32.partialorder %v815_v32, 0.0  ;;  %v234_v58 = vand.u32 2147483648, %v815_v32 }
  0x4a   : > { %565 = vrsqrt.f32 %v817_v33  ;;  %vm243_vm3 = vcmp.eq.f32.partialorder %v817_v33, inf  ;;  %vm245_vm4 = vcmp.eq.f32.partialorder %v817_v33, 0.0  ;;  %v246_v61 = vand.u32 2147483648, %v817_v33 }
  0x4b   : > { %567 = vrsqrt.f32 %v819_v34  ;;  %vm255_vm5 = vcmp.eq.f32.partialorder %v819_v34, inf  ;;  %vm257_vm6 = vcmp.eq.f32.partialorder %v819_v34, 0.0  ;;  %v258_v8 = vand.u32 2147483648, %v819_v34 }
  0x4c   : > { %569 = vrsqrt.f32 %v821_v35  ;;  %vm267_vm7 = vcmp.eq.f32.partialorder %v821_v35, inf  ;;  %vm269_vm8 = vcmp.eq.f32.partialorder %v821_v35, 0.0  ;;  %v270_v14 = vand.u32 2147483648, %v821_v35 }
  0x4f   : > { %v564_v36 = vpop.eup %563 }
  0x50   : > { %v566_v37 = vpop.eup %565  ;;  %v225_v38 = vmul.f32 %v564_v36, %v815_v32 }
  0x51   : > { %v568_v39 = vpop.eup %567  ;;  %v237_v40 = vmul.f32 %v566_v37, %v817_v33 }
  0x52   : > { %v570_v42 = vpop.eup %569  ;;  %v226_v43 = vmul.f32 %v564_v36, %v225_v38  ;;  %v249_v46 = vmul.f32 %v568_v39, %v819_v34 }
  0x53   : > { %v238_v47 = vmul.f32 %v566_v37, %v237_v40  ;;  %v261_v50 = vmul.f32 %v570_v42, %v821_v35 }
  0x54   : > { %v227_v51 = vmul.f32 0.5, %v226_v43  ;;  %v250_v54 = vmul.f32 %v568_v39, %v249_v46 }
  0x55   : > { %v239_v55 = vmul.f32 0.5, %v238_v47  ;;  %v262_v56 = vmul.f32 %v570_v42, %v261_v50 }
  0x56   : > { %v228_v57 = vsub.f32 1.5, %v227_v51  ;;  %v251_v59 = vmul.f32 0.5, %v250_v54 }
  0x57   : > { %v240_v60 = vsub.f32 1.5, %v239_v55  ;;  %v263_v62 = vmul.f32 0.5, %v262_v56 }
  0x58   : > { %v229_v63 = vmul.f32 %v564_v36, %v228_v57  ;;  %v252_v2 = vsub.f32 1.5, %v251_v59 }
  0x59   : > { %v241_v3 = vmul.f32 %v566_v37, %v240_v60  ;;  %v264_v5 = vsub.f32 1.5, %v263_v62 }
  0x5a   : > { %v230_v6 = vmul.f32 %v229_v63, %v815_v32  ;;  %v253_v7 = vmul.f32 %v568_v39, %v252_v2 }
  0x5b   : > { %v242_v9 = vmul.f32 %v241_v3, %v817_v33  ;;  %v265_v11 = vmul.f32 %v570_v42, %v264_v5 }
  0x5c   : > { %v232_v12 = vsel %vm231_vm1, %v815_v32, %v230_v6  ;;  %v254_v13 = vmul.f32 %v253_v7, %v819_v34 }
  0x5d   : > { %v235_v15 = vsel %vm233_vm2, %v234_v58, %v232_v12  ;;  %v244_v16 = vsel %vm243_vm3, %v817_v33, %v242_v9  ;;  %v266_v18 = vmul.f32 %v265_v11, %v821_v35 }
  0x5e   : > { %v247_v19 = vsel %vm245_vm4, %v246_v61, %v244_v16  ;;  %v278_v20 = vmul.f32 %v833_v41, %v235_v15  ;;  %v287_v21 = vmul.f32 %v835_v44, %v235_v15  ;;  %v256_v22 = vsel %vm255_vm5, %v819_v34, %v254_v13 }
  0x5f   : > { %v279_v23 = vmul.f32 %v833_v41, %v247_v19  ;;  %v288_v24 = vmul.f32 %v835_v44, %v247_v19  ;;  %v259_v25 = vsel %vm257_vm6, %v258_v8, %v256_v22  ;;  %v268_v26 = vsel %vm267_vm7, %v821_v35, %v266_v18 }
  0x60   : > { %v283_v27 = vadd.f32 %v837_v45, %v278_v20  ;;  %v292_v28 = vadd.f32 %v840_v48, %v287_v21  ;;  %v271_v29 = vsel %vm269_vm8, %v270_v14, %v268_v26  ;;  %v280_v30 = vmul.f32 %v833_v41, %v259_v25 }
  0x61   : > { %v284_v31 = vadd.f32 %v837_v45, %v279_v23  ;;  %v293_v32 = vadd.f32 %v840_v48, %v288_v24  ;;  %v281_v33 = vmul.f32 %v833_v41, %v271_v29  ;;  %v289_v34 = vmul.f32 %v835_v44, %v259_v25 }
  0x62   : > { %v298_v36 = vmul.f32 %v283_v27, %v235_v15  ;;  %v307_v37 = vmul.f32 %v292_v28, %v235_v15  ;;  %v285_v38 = vadd.f32 %v837_v45, %v280_v30  ;;  %v290_v39 = vmul.f32 %v835_v44, %v271_v29 }
  0x63   : > { %v299_v40 = vmul.f32 %v284_v31, %v247_v19  ;;  %v308_v42 = vmul.f32 %v293_v32, %v247_v19  ;;  %v286_v35 = vadd.f32 %v837_v45, %v281_v33  ;;  %v294_v43 = vadd.f32 %v840_v48, %v289_v34 }
  0x64   : > { %v303_v46 = vadd.f32 %v842_v49, %v298_v36  ;;  %v312_v47 = vadd.f32 %v847_v52, %v307_v37  ;;  %v295_v41 = vadd.f32 %v840_v48, %v290_v39  ;;  %v300_v50 = vmul.f32 %v285_v38, %v259_v25 }
  0x65   : > { %v304_v51 = vadd.f32 %v842_v49, %v299_v40  ;;  %v313_v54 = vadd.f32 %v847_v52, %v308_v42  ;;  %v301_v44 = vmul.f32 %v286_v35, %v271_v29  ;;  %v309_v55 = vmul.f32 %v294_v43, %v259_v25 }
  0x66   : > { %v318_v56 = vmul.f32 %v303_v46, %v235_v15  ;;  %v327_v57 = vmul.f32 %v312_v47, %v235_v15  ;;  %v305_v45 = vadd.f32 %v842_v49, %v300_v50  ;;  %v310_v58 = vmul.f32 %v295_v41, %v271_v29 }
  0x67   : > { %v319_v59 = vmul.f32 %v304_v51, %v247_v19  ;;  %v328_v60 = vmul.f32 %v313_v54, %v247_v19  ;;  %v306_v61 = vadd.f32 %v842_v49, %v301_v44  ;;  %v314_v48 = vadd.f32 %v847_v52, %v309_v55 }
  0x68   : > { %v323_v62 = vadd.f32 %v849_v53, %v318_v56  ;;  %v332_v63 = vadd.f32 %v858_v0, %v327_v57  ;;  %v315_v2 = vadd.f32 %v847_v52, %v310_v58  ;;  %v320_v3 = vmul.f32 %v305_v45, %v259_v25 }
  0x69   : > { %v324_v4 = vadd.f32 %v849_v53, %v319_v59  ;;  %v333_v5 = vadd.f32 %v858_v0, %v328_v60  ;;  %v321_v6 = vmul.f32 %v306_v61, %v271_v29  ;;  %v329_v7 = vmul.f32 %v314_v48, %v259_v25 }
  0x6a   : > { %v338_v8 = vmul.f32 %v323_v62, %v235_v15  ;;  %v347_v9 = vmul.f32 %v332_v63, %v235_v15  ;;  %v325_v49 = vadd.f32 %v849_v53, %v320_v3  ;;  %v330_v11 = vmul.f32 %v315_v2, %v271_v29 }
  0x6b   : > { %v339_v12 = vmul.f32 %v324_v4, %v247_v19  ;;  %v348_v13 = vmul.f32 %v333_v5, %v247_v19  ;;  %v326_v14 = vadd.f32 %v849_v53, %v321_v6  ;;  %v334_v16 = vadd.f32 %v858_v0, %v329_v7 }
  0x6c   : > { %v352_v52 = vadd.f32 %v869_v10, %v347_v9  ;;  %v335_v18 = vadd.f32 %v858_v0, %v330_v11  ;;  %v340_v20 = vmul.f32 %v325_v49, %v259_v25  ;;  %v343_v19 = vadd.f32 %v861_v1, %v338_v8 }
  0x6d   : > { %v344_v15 = vadd.f32 %v861_v1, %v339_v12  ;;  %v353_v21 = vadd.f32 %v869_v10, %v348_v13  ;;  %v341_v22 = vmul.f32 %v326_v14, %v271_v29  ;;  %v349_v23 = vmul.f32 %v334_v16, %v259_v25 }
  0x6e   : > { %v350_v53 = vmul.f32 %v335_v18, %v271_v29  ;;  %v360_v24 = vsel %vm359_vm10, %v352_v52, 0.0  ;;  %v345_v30 = vadd.f32 %v861_v1, %v340_v20 }
  0x6f   : > { %v361_v26 = vsel %vm359_vm10, %v353_v21, 0.0  ;;  %v346_v0 = vadd.f32 %v861_v1, %v341_v22  ;;  %v354_v27 = vadd.f32 %v869_v10, %v349_v23  ;;  %v364_v31 = vsel %vm358_vm9, %v343_v19, %v360_v24 }
  0x70   : > { %v365_v25 = vsel %vm358_vm9, %v344_v15, %v361_v26  ;;  %v355_v28 = vadd.f32 %v869_v10, %v350_v53 }
  0x71   : > { %v372_v29 = vrot.slane %v365_v25, 4  ;;  %v362_v32 = vsel %vm359_vm10, %v354_v27, 0.0 }
  0x72   : > { %v363_v33 = vsel %vm359_vm10, %v355_v28, 0.0  ;;  %v366_v1 = vsel %vm358_vm9, %v345_v30, %v362_v32 }
  0x73   : > { %v374_v10 = vsel %vm195_vm0, %v364_v31, %v372_v29  ;;  %v367_v34 = vsel %vm358_vm9, %v346_v0, %v363_v33 }
  0x74   : > { %378 = vst [vmem:[%s175_s24] sm:$0xff] %v374_v10  ;;  %v373_v36 = vrot.slane %v367_v34, 4 }
  0x76   : > { %v375_v37 = vsel %vm195_vm0, %v366_v1, %v373_v36 }
  0x77   : > { %379 = vst [vmem:[%s175_s24 + $0x8] sm:$0xff] %v375_v37 }
  0x78   : > { %643 = shalt.err (!%p640_p11)
}
  0x79   : > { %512 = dma.vmem_to_hbm [thread:$0]  (%p770_p3), %s395_s28, 256, %s397_s30, %s381_s29  }
  0x7a PF: > { %s408_s27 = sand.u32 1, %s674_s9   ;;  %p1001_p12 = scmp.ge.s32.totalorder %s686_s12, 2 }
  0x7b   : > { %s409_s8 = scalar_lea.sflag [#allocation4], %s408_s27 }
  0x7c   : > { %p523_p13 = pnand %p1001_p12, %p739_p6 }
  0x7e   : > { %p524_p0 = pneg %p523_p13 }
  0x80   : > { %669 = dma.done.wait (%p524_p0), %s409_s8, 256  }
  0x81   : > { %671 = vsyncadd (%p524_p0), %s409_s8, 4294967040  ;;  %p16_p5 = scmp.ge.s32.totalorder %s755_s21, 4   ;;  %s1002_s9 = smov %s678_s10 }
  0x82   : > { %s1003_s10 = smov %s682_s11  ;;  %s1004_s11 = smov %s765_s25 }
  0x83   : > { %s1005_s12 = smov %s755_s21  ;;  %18 = sbr.rel (!%p16_p5) target bundleno = 6 (0x6), region = 79 }
  0x88   :  { %415 = vsyncpa [#allocation3], 1 }
  0x89   :  { %417 = vsyncpa [#allocation3 + $0x1], 1 }
  0x8a   :  { %418 = vsyncpa [#allocation4], 1 }
  0x8b   :  { %420 = vsyncpa [#allocation4 + $0x1], 1 }
  0x8c   :  { %421 = vsyncpa [#allocation5], 1 }
  0x8d   :  { %423 = vsyncpa [#allocation5 + $0x1], 1 }

</bundles_post_ra>
